<compile_context>
chip_gen: v7x
topology: tpu7x:2x2x1
jax: 0.10.0
libtpu: 0.0.40
codegen_flags: <defaults>
</compile_context>

<pallas_src>
import math

import jax
import jax.numpy as jnp
from jax import lax
from jax.experimental import pallas as pl
from jax.experimental.pallas import tpu as pltpu

BN_EPS = 1e-5
LN_EPS = 1e-5


# -------------------------- hardware-aware budgets ----------------------------

def _vmem_capacity_bytes():
    try:
        return int(pltpu.get_tpu_info().vmem_capacity_bytes)
    except Exception:
        return 64 << 20          # conservative (v7x-sized) fallback


_VMEM_CAP = _vmem_capacity_bytes()
if _VMEM_CAP >= (100 << 20):     # v5e / v6e: 128 MiB physical VMEM
    _TILE_BUDGET = 48 << 20      # sizes TN for the tiled fallback passes
    _FUSED_BUDGET = 56 << 20     # max footprint of the fused per-batch pass
    _VMEM_LIMIT = 96 << 20
else:                            # v7x: 64 MiB per TensorCore
    _TILE_BUDGET = 16 << 20
    _FUSED_BUDGET = 28 << 20
    _VMEM_LIMIT = 48 << 20


def _choose_tile_n(n, c, budget_bytes):
    """Largest multiple of 128 dividing N such that the worst-case pass (apply pass:
    x, ln_w, ln_b, out = 4 streams x 2 double-buffers of (C, TN) f32) fits the budget."""
    if n % 128 != 0:
        # Full-dim block is always legal.  TODO(synk): pad+mask fallback for very large,
        # non-128-multiple N so this cannot overshoot the VMEM limit.
        return n
    cap = max(128, budget_bytes // (8 * 4 * c))   # 8 double-buffered f32 (C, TN) streams
    best, tn = 128, 128
    while tn <= n:
        if n % tn == 0 and tn <= cap:
            best = tn
        tn += 128
    return best


# ----------------------------- kernel bodies ----------------------------------

def _conv_bn_relu(x, w, b, bn_scale, bn_shift):
    """Shared tile math: 1x1 conv (channel matmul), folded-BN affine, residual, ReLU."""
    y = jnp.dot(w, x, preferred_element_type=jnp.float32) + b          # (C, TN)
    return jnp.maximum(y * bn_scale + bn_shift + x, 0.0)


def bn_stats_kernel(x_ref, w_ref, b_ref, sum_ref, sq_ref):
    # x_ref: (1, C, TN)   w_ref: (C, C)   b_ref: (C, 1)
    # sum_ref/sq_ref: (1, 1, C) accumulators, resident across the n (last) grid axis.
    @pl.when(pl.program_id(1) == 0)
    def _():
        sum_ref[...] = jnp.zeros_like(sum_ref)
        sq_ref[...] = jnp.zeros_like(sq_ref)

    y = jnp.dot(w_ref[...], x_ref[0], preferred_element_type=jnp.float32) + b_ref[...]
    sum_ref[...] += jnp.sum(y, axis=1)[None, None, :]
    sq_ref[...] += jnp.sum(y * y, axis=1)[None, None, :]


def ln_stats_kernel(x_ref, w_ref, b_ref, bns_ref, bnh_ref, sum_ref, sq_ref):
    # Tiled fallback only.  sum_ref/sq_ref: (1, 1, 1) accumulators resident across n.
    @pl.when(pl.program_id(1) == 0)
    def _():
        sum_ref[...] = jnp.zeros_like(sum_ref)
        sq_ref[...] = jnp.zeros_like(sq_ref)

    z = _conv_bn_relu(x_ref[0], w_ref[...], b_ref[...], bns_ref[...], bnh_ref[...])
    sum_ref[...] = sum_ref[...] + jnp.sum(z)
    sq_ref[...] = sq_ref[...] + jnp.sum(z * z)


def apply_kernel(x_ref, w_ref, b_ref, bns_ref, bnh_ref, lnw_ref, lnb_ref, stat_ref, o_ref):
    # Tiled fallback only.  Grid is (NT, B): b is the inner axis so ln_w/ln_b tiles
    # (index_map constant in b) stay resident and are not re-fetched per batch element.
    bi = pl.program_id(1)
    z = _conv_bn_relu(x_ref[0], w_ref[...], b_ref[...], bns_ref[...], bnh_ref[...])
    mu = stat_ref[bi, 0]                                               # SMEM scalars
    rstd = stat_ref[bi, 1]
    o_ref[0] = ((z - mu) * rstd * lnw_ref[...] + lnb_ref[...]).astype(o_ref.dtype)


def fused_ln_kernel(x_ref, w_ref, b_ref, bns_ref, bnh_ref, lnw_ref, lnb_ref, o_ref):
    # Fused LN-stats + apply: whole (C, N) slab per batch element, grid (B,).
    z = _conv_bn_relu(x_ref[0], w_ref[...], b_ref[...], bns_ref[...], bnh_ref[...])
    cnt = z.shape[0] * z.shape[1]
    mu = jnp.sum(z) / cnt
    zc = z - mu
    var = jnp.sum(zc * zc) / cnt                       # centered (two-pass) -> stable
    rstd = lax.rsqrt(var + LN_EPS)
    o_ref[0] = (zc * rstd * lnw_ref[...] + lnb_ref[...]).astype(o_ref.dtype)


# ------------------------------- wrapper ---------------------------------------

def my_adapter_dict_forward(x_ncthw, conv_w, conv_b, bn_w, bn_b, ln_w, ln_b, fuse_ln=None):
    """FrameWise2dAdapter + LayerNorm forward.

    x_ncthw : (B, C, T, H, W) f32
    conv_w  : (C, C)  1x1 conv weight [c_out, c_in];  conv_b: (C,)
    bn_w/bn_b : (C,) BatchNorm3d affine
    ln_w/ln_b : (C, T, H, W) LayerNorm affine (native torch layout)
    fuse_ln : None = auto (fit-based), True/False = force fused / tiled LN path.
    """
    B, C, T, H, W = x_ncthw.shape
    N = T * H * W
    TN = _choose_tile_n(N, C, _TILE_BUDGET)
    NT = N // TN

    # Free reshapes -- no HBM transpose anywhere.
    x2 = x_ncthw.reshape(B, C, N)
    ln_w2 = ln_w.reshape(C, N)
    ln_b2 = ln_b.reshape(C, N)
    conv_b2 = conv_b.reshape(C, 1)

    x_spec = pl.BlockSpec((1, C, TN), lambda b, n: (b, 0, n))
    w_spec = pl.BlockSpec((C, C), lambda b, n: (0, 0))
    cvec_spec = pl.BlockSpec((C, 1), lambda b, n: (0, 0))

    # ---- pass 1: BatchNorm batch statistics (per channel, over B and N) -------
    # Outputs are accumulated in-kernel across the n axis (resident output block),
    # so only B small writebacks happen instead of B*NT masked micro-stores.
    bn_sum, bn_sq = pl.pallas_call(
        bn_stats_kernel,
        out_shape=(jax.ShapeDtypeStruct((B, 1, C), jnp.float32),
                   jax.ShapeDtypeStruct((B, 1, C), jnp.float32)),
        grid=(B, NT),
        in_specs=[x_spec, w_spec, cvec_spec],
        out_specs=(pl.BlockSpec((1, 1, C), lambda b, n: (b, 0, 0)),
                   pl.BlockSpec((1, 1, C), lambda b, n: (b, 0, 0))),
        compiler_params=pltpu.CompilerParams(
            dimension_semantics=("parallel", "arbitrary"),
            vmem_limit_bytes=_VMEM_LIMIT),
    )(x2, conv_w, conv_b2)

    cnt_bn = float(B * N)
    mean_c = jnp.sum(bn_sum, axis=(0, 1)) / cnt_bn                      # (C,)
    var_c = jnp.sum(bn_sq, axis=(0, 1)) / cnt_bn - mean_c * mean_c      # biased (train) var
    inv_c = lax.rsqrt(var_c + BN_EPS)
    bn_scale = (bn_w * inv_c).reshape(C, 1)
    bn_shift = (bn_b - mean_c * bn_w * inv_c).reshape(C, 1)

    # ---- decide fused vs tiled LayerNorm path ---------------------------------
    # Fused footprint: 4 streamed (C, N) f32 arrays (x, ln_w, ln_b, out) double-buffered.
    fused_bytes = 8 * C * N * 4
    use_fused = fused_bytes <= _FUSED_BUDGET if fuse_ln is None else bool(fuse_ln)

    if use_fused:
        # ---- fused pass 2+3: BN affine + residual + ReLU + LayerNorm ----------
        # One read of x, one conv pass; LN mean/var computed in-kernel (two-pass, centered).
        out2 = pl.pallas_call(
            fused_ln_kernel,
            out_shape=jax.ShapeDtypeStruct((B, C, N), jnp.float32),
            grid=(B,),
            in_specs=[pl.BlockSpec((1, C, N), lambda b: (b, 0, 0)),
                      pl.BlockSpec((C, C), lambda b: (0, 0)),
                      pl.BlockSpec((C, 1), lambda b: (0, 0)),
                      pl.BlockSpec((C, 1), lambda b: (0, 0)),
                      pl.BlockSpec((C, 1), lambda b: (0, 0)),
                      pl.BlockSpec((C, N), lambda b: (0, 0)),
                      pl.BlockSpec((C, N), lambda b: (0, 0))],
            out_specs=pl.BlockSpec((1, C, N), lambda b: (b, 0, 0)),
            compiler_params=pltpu.CompilerParams(
                dimension_semantics=("parallel",),      # B >= 2 keeps both v7x TCs busy
                vmem_limit_bytes=_VMEM_LIMIT),
        )(x2, conv_w, conv_b2, bn_scale, bn_shift, ln_w2, ln_b2)
        return out2.reshape(B, C, T, H, W)

    # ---- tiled fallback: pass 2 (LN stats, accumulated) ------------------------
    ln_sum, ln_sq = pl.pallas_call(
        ln_stats_kernel,
        out_shape=(jax.ShapeDtypeStruct((B, 1, 1), jnp.float32),
                   jax.ShapeDtypeStruct((B, 1, 1), jnp.float32)),
        grid=(B, NT),
        in_specs=[x_spec, w_spec, cvec_spec, cvec_spec, cvec_spec],
        out_specs=(pl.BlockSpec((1, 1, 1), lambda b, n: (b, 0, 0)),
                   pl.BlockSpec((1, 1, 1), lambda b, n: (b, 0, 0))),
        compiler_params=pltpu.CompilerParams(
            dimension_semantics=("parallel", "arbitrary"),
            vmem_limit_bytes=_VMEM_LIMIT),
    )(x2, conv_w, conv_b2, bn_scale, bn_shift)

    cnt_ln = float(C * N)
    mu_b = ln_sum[:, 0, 0] / cnt_ln                                     # (B,)
    var_b = ln_sq[:, 0, 0] / cnt_ln - mu_b * mu_b
    rstd_b = lax.rsqrt(var_b + LN_EPS)
    ln_stats = jnp.stack([mu_b, rstd_b], axis=1).astype(jnp.float32)    # (B, 2) -> SMEM

    # ---- tiled fallback: pass 3 (apply), grid (NT, B) so ln_w/ln_b stay resident
    out2 = pl.pallas_call(
        apply_kernel,
        out_shape=jax.ShapeDtypeStruct((B, C, N), jnp.float32),
        grid=(NT, B),
        in_specs=[pl.BlockSpec((1, C, TN), lambda n, b: (b, 0, n)),
                  pl.BlockSpec((C, C), lambda n, b: (0, 0)),
                  pl.BlockSpec((C, 1), lambda n, b: (0, 0)),
                  pl.BlockSpec((C, 1), lambda n, b: (0, 0)),
                  pl.BlockSpec((C, 1), lambda n, b: (0, 0)),
                  pl.BlockSpec((C, TN), lambda n, b: (0, n)),
                  pl.BlockSpec((C, TN), lambda n, b: (0, n)),
                  pl.BlockSpec(memory_space=pltpu.MemorySpace.SMEM)],
        out_specs=pl.BlockSpec((1, C, TN), lambda n, b: (b, 0, n)),
        compiler_params=pltpu.CompilerParams(
            dimension_semantics=("parallel", "parallel"),
            vmem_limit_bytes=_VMEM_LIMIT),
    )(x2, conv_w, conv_b2, bn_scale, bn_shift, ln_w2, ln_b2, ln_stats)

    return out2.reshape(B, C, T, H, W)


# ------------------------------ reference --------------------------------------

def reference_forward(x, conv_w, conv_b, bn_w, bn_b, ln_w, ln_b):
    """Pure-JAX reference mirroring the torch module (train-mode BN)."""
    B, C, T, H, W = x.shape
    N = T * H * W
    xf = x.reshape(B, C, N)
    y = jnp.einsum("dc,bcn->bdn", conv_w, xf) + conv_b[None, :, None]
    mean_c = jnp.mean(y, axis=(0, 2), keepdims=True)
    var_c = jnp.mean((y - mean_c) ** 2, axis=(0, 2), keepdims=True)
    y = (y - mean_c) / jnp.sqrt(var_c + BN_EPS) * bn_w[None, :, None] + bn_b[None, :, None]
    z = jnp.maximum(y + xf, 0.0)
    mu = jnp.mean(z, axis=(1, 2), keepdims=True)
    var = jnp.mean((z - mu) ** 2, axis=(1, 2), keepdims=True)
    out = (z - mu) / jnp.sqrt(var + LN_EPS)
    out = out * ln_w.reshape(1, C, N) + ln_b.reshape(1, C, N)
    return out.reshape(B, C, T, H, W)


# --------------------------------- demo -----------------------------------------

if __name__ == "__main__":
    # Small shapes consistent with the module (NCTHW); H == W (LayerNorm is [C, T, H, H]).
    B, C, T, H, W = 2, 32, 4, 8, 8

    key = jax.random.PRNGKey(0)
    ks = jax.random.split(key, 7)

    x = jax.random.normal(ks[0], (B, C, T, H, W), dtype=jnp.float32)

    # Conv2d(C, C, 1): kaiming_normal_ weight (fan_in = C), default bias init.
    conv_w = jax.random.normal(ks[1], (C, C), dtype=jnp.float32) * math.sqrt(2.0 / C)
    bound = 1.0 / math.sqrt(C)
    conv_b = jax.random.uniform(ks[2], (C,), minval=-bound, maxval=bound, dtype=jnp.float32)

    # Non-trivial affine params so any layout bug is caught against the reference.
    bn_w = jax.random.uniform(ks[3], (C,), minval=0.5, maxval=1.5, dtype=jnp.float32)
    bn_b = 0.1 * jax.random.normal(ks[4], (C,), dtype=jnp.float32)
    ln_w = jax.random.uniform(ks[5], (C, T, H, W), minval=0.5, maxval=1.5, dtype=jnp.float32)
    ln_b = 0.1 * jax.random.normal(ks[6], (C, T, H, W), dtype=jnp.float32)

    fwd = jax.jit(my_adapter_dict_forward, static_argnames=("fuse_ln",))
    ref = reference_forward(x, conv_w, conv_b, bn_w, bn_b, ln_w, ln_b)

    # Fused LN path (default for these shapes).
    out_fused = jax.block_until_ready(fwd(x, conv_w, conv_b, bn_w, bn_b, ln_w, ln_b,
                                          fuse_ln=True))
    assert out_fused.shape == (B, C, T, H, W)
    assert jnp.allclose(out_fused, ref, atol=2e-4, rtol=2e-4), "fused path mismatch vs reference"

    # Tiled fallback path (used for shapes whose per-batch slab exceeds the VMEM budget).
    out_tiled = jax.block_until_ready(fwd(x, conv_w, conv_b, bn_w, bn_b, ln_w, ln_b,
                                          fuse_ln=False))
    assert jnp.allclose(out_tiled, ref, atol=2e-4, rtol=2e-4), "tiled path mismatch vs reference"

    print("KERNEL_OK")
</pallas_src>

<mosaic_0001>
module attributes {stable_mosaic.version = 11 : i64} {
  func.func @bn_stats_kernel(%arg0: i32, %arg1: i32, %arg2: memref<1x32x256xf32, #tpu.memory_space<vmem>>, %arg3: memref<32x32xf32, #tpu.memory_space<vmem>>, %arg4: memref<32x1xf32, #tpu.memory_space<vmem>>, %arg5: memref<1x1x32xf32, #tpu.memory_space<vmem>>, %arg6: memref<1x1x32xf32, #tpu.memory_space<vmem>>) attributes {dimension_semantics = [#tpu.dimension_semantics<parallel>, #tpu.dimension_semantics<arbitrary>], iteration_bounds = array<i64: 2, 1>, scalar_prefetch = 0 : i64, scratch_operands = 0 : i64, tpu.core_type = #tpu.core_type<tc>, window_params = [{transform_indices = @transform_0, window_bounds = array<i64: 1, 32, 256>}, {pipeline_mode = #tpu.pipeline_mode<synchronous>, transform_indices = @transform_1, window_bounds = array<i64: 32, 32>}, {pipeline_mode = #tpu.pipeline_mode<synchronous>, transform_indices = @transform_2, window_bounds = array<i64: 32, 1>}, {transform_indices = @transform_3, window_bounds = array<i64: 1, 1, 32>}, {transform_indices = @transform_4, window_bounds = array<i64: 1, 1, 32>}]} {
    %c0_i32 = arith.constant 0 : i32
    %0 = arith.cmpi eq, %arg1, %c0_i32 : i32
    %1 = arith.extui %0 : i1 to i32
    %c0_i32_0 = arith.constant 0 : i32
    %2 = arith.cmpi ne, %1, %c0_i32_0 : i32
    scf.if %2 {
      %cst_21 = arith.constant 0.000000e+00 : f32
      %21 = vector.broadcast %cst_21 : f32 to vector<1x1x32xf32>
      %c0_22 = arith.constant 0 : index
      %c0_23 = arith.constant 0 : index
      %c0_24 = arith.constant 0 : index
      %22 = vector.load %arg5[%c0_22, %c0_23, %c0_24] : memref<1x1x32xf32, #tpu.memory_space<vmem>>, vector<1x1x32xf32>
      tpu.vector_store %arg5[%c0_22, %c0_23, %c0_24], %21 {strides = array<i32>} : memref<1x1x32xf32, #tpu.memory_space<vmem>>, vector<1x1x32xf32>,
      %cst_25 = arith.constant 0.000000e+00 : f32
      %23 = vector.broadcast %cst_25 : f32 to vector<1x1x32xf32>
      %c0_26 = arith.constant 0 : index
      %c0_27 = arith.constant 0 : index
      %c0_28 = arith.constant 0 : index
      %24 = vector.load %arg6[%c0_26, %c0_27, %c0_28] : memref<1x1x32xf32, #tpu.memory_space<vmem>>, vector<1x1x32xf32>
      tpu.vector_store %arg6[%c0_26, %c0_27, %c0_28], %23 {strides = array<i32>} : memref<1x1x32xf32, #tpu.memory_space<vmem>>, vector<1x1x32xf32>,
    } else {
    }
    %c0 = arith.constant 0 : index
    %c0_1 = arith.constant 0 : index
    %3 = vector.load %arg3[%c0, %c0_1] : memref<32x32xf32, #tpu.memory_space<vmem>>, vector<32x32xf32>
    %c0_2 = arith.constant 0 : index
    %c0_3 = arith.constant 0 : index
    %c0_4 = arith.constant 0 : index
    %4 = vector.load %arg2[%c0_2, %c0_3, %c0_4] : memref<1x32x256xf32, #tpu.memory_space<vmem>>, vector<1x32x256xf32>
    %5 = vector.shape_cast %4 : vector<1x32x256xf32> to vector<32x256xf32>
    %cst = arith.constant dense<0.000000e+00> : vector<32x256xf32>
    %6 = tpu.matmul %3, %5, %cst {dimension_numbers = #tpu.dot_dimension_numbers<[1], [0], [0], [1], [0, 0, 1, 1], [], []>} : vector<32x32xf32>, vector<32x256xf32>, vector<32x256xf32> -> vector<32x256xf32>
    %c0_5 = arith.constant 0 : index
    %c0_6 = arith.constant 0 : index
    %7 = vector.load %arg4[%c0_5, %c0_6] : memref<32x1xf32, #tpu.memory_space<vmem>>, vector<32x1xf32>
    %8 = vector.broadcast %7 : vector<32x1xf32> to vector<32x256xf32>
    %9 = arith.addf %6, %8 : vector<32x256xf32>
    %c0_7 = arith.constant 0 : index
    %c0_8 = arith.constant 0 : index
    %c0_9 = arith.constant 0 : index
    %10 = vector.load %arg5[%c0_7, %c0_8, %c0_9] : memref<1x1x32xf32, #tpu.memory_space<vmem>>, vector<1x1x32xf32>
    %cst_10 = arith.constant dense<0.000000e+00> : vector<32xf32>
    %11 = vector.multi_reduction <add>, %9, %cst_10 [1] : vector<32x256xf32> to vector<32xf32>
    %12 = vector.shape_cast %11 : vector<32xf32> to vector<1x1x32xf32>
    %13 = arith.addf %10, %12 : vector<1x1x32xf32>
    %c0_11 = arith.constant 0 : index
    %c0_12 = arith.constant 0 : index
    %c0_13 = arith.constant 0 : index
    %14 = vector.load %arg5[%c0_11, %c0_12, %c0_13] : memref<1x1x32xf32, #tpu.memory_space<vmem>>, vector<1x1x32xf32>
    tpu.vector_store %arg5[%c0_11, %c0_12, %c0_13], %13 {strides = array<i32>} : memref<1x1x32xf32, #tpu.memory_space<vmem>>, vector<1x1x32xf32>,
    %c0_14 = arith.constant 0 : index
    %c0_15 = arith.constant 0 : index
    %c0_16 = arith.constant 0 : index
    %15 = vector.load %arg6[%c0_14, %c0_15, %c0_16] : memref<1x1x32xf32, #tpu.memory_space<vmem>>, vector<1x1x32xf32>
    %16 = arith.mulf %9, %9 : vector<32x256xf32>
    %cst_17 = arith.constant dense<0.000000e+00> : vector<32xf32>
    %17 = vector.multi_reduction <add>, %16, %cst_17 [1] : vector<32x256xf32> to vector<32xf32>
    %18 = vector.shape_cast %17 : vector<32xf32> to vector<1x1x32xf32>
    %19 = arith.addf %15, %18 : vector<1x1x32xf32>
    %c0_18 = arith.constant 0 : index
    %c0_19 = arith.constant 0 : index
    %c0_20 = arith.constant 0 : index
    %20 = vector.load %arg6[%c0_18, %c0_19, %c0_20] : memref<1x1x32xf32, #tpu.memory_space<vmem>>, vector<1x1x32xf32>
    tpu.vector_store %arg6[%c0_18, %c0_19, %c0_20], %19 {strides = array<i32>} : memref<1x1x32xf32, #tpu.memory_space<vmem>>, vector<1x1x32xf32>,
    return
  }
  func.func @transform_0(%arg0: i32, %arg1: i32) -> (i32, i32, i32) {
    %c0_i32 = arith.constant 0 : i32
    %c0_i32_0 = arith.constant 0 : i32
    return %arg0, %c0_i32, %arg1 : i32, i32, i32
  }
  func.func @transform_1(%arg0: i32, %arg1: i32) -> (i32, i32) {
    %c0_i32 = arith.constant 0 : i32
    %c0_i32_0 = arith.constant 0 : i32
    %c0_i32_1 = arith.constant 0 : i32
    return %c0_i32, %c0_i32_0 : i32, i32
  }
  func.func @transform_2(%arg0: i32, %arg1: i32) -> (i32, i32) {
    %c0_i32 = arith.constant 0 : i32
    %c0_i32_0 = arith.constant 0 : i32
    %c0_i32_1 = arith.constant 0 : i32
    return %c0_i32, %c0_i32_0 : i32, i32
  }
  func.func @transform_3(%arg0: i32, %arg1: i32) -> (i32, i32, i32) {
    %c0_i32 = arith.constant 0 : i32
    %c0_i32_0 = arith.constant 0 : i32
    %c0_i32_1 = arith.constant 0 : i32
    return %arg0, %c0_i32, %c0_i32_0 : i32, i32, i32
  }
  func.func @transform_4(%arg0: i32, %arg1: i32) -> (i32, i32, i32) {
    %c0_i32 = arith.constant 0 : i32
    %c0_i32_0 = arith.constant 0 : i32
    %c0_i32_1 = arith.constant 0 : i32
    return %arg0, %c0_i32, %c0_i32_0 : i32, i32, i32
  }
}

module attributes {stable_mosaic.version = 11 : i64} {
  func.func @fused_ln_kernel(%arg0: i32, %arg1: memref<1x32x256xf32, #tpu.memory_space<vmem>>, %arg2: memref<32x32xf32, #tpu.memory_space<vmem>>, %arg3: memref<32x1xf32, #tpu.memory_space<vmem>>, %arg4: memref<32x1xf32, #tpu.memory_space<vmem>>, %arg5: memref<32x1xf32, #tpu.memory_space<vmem>>, %arg6: memref<32x256xf32, #tpu.memory_space<vmem>>, %arg7: memref<32x256xf32, #tpu.memory_space<vmem>>, %arg8: memref<1x32x256xf32, #tpu.memory_space<vmem>>) attributes {dimension_semantics = [#tpu.dimension_semantics<parallel>], iteration_bounds = array<i64: 2>, scalar_prefetch = 0 : i64, scratch_operands = 0 : i64, tpu.core_type = #tpu.core_type<tc>, window_params = [{transform_indices = @transform_0, window_bounds = array<i64: 1, 32, 256>}, {pipeline_mode = #tpu.pipeline_mode<synchronous>, transform_indices = @transform_1, window_bounds = array<i64: 32, 32>}, {pipeline_mode = #tpu.pipeline_mode<synchronous>, transform_indices = @transform_2, window_bounds = array<i64: 32, 1>}, {pipeline_mode = #tpu.pipeline_mode<synchronous>, transform_indices = @transform_3, window_bounds = array<i64: 32, 1>}, {pipeline_mode = #tpu.pipeline_mode<synchronous>, transform_indices = @transform_4, window_bounds = array<i64: 32, 1>}, {pipeline_mode = #tpu.pipeline_mode<synchronous>, transform_indices = @transform_5, window_bounds = array<i64: 32, 256>}, {pipeline_mode = #tpu.pipeline_mode<synchronous>, transform_indices = @transform_6, window_bounds = array<i64: 32, 256>}, {transform_indices = @transform_7, window_bounds = array<i64: 1, 32, 256>}]} {
    %c0 = arith.constant 0 : index
    %c0_0 = arith.constant 0 : index
    %c0_1 = arith.constant 0 : index
    %0 = vector.load %arg1[%c0, %c0_0, %c0_1] : memref<1x32x256xf32, #tpu.memory_space<vmem>>, vector<1x32x256xf32>
    %1 = vector.shape_cast %0 : vector<1x32x256xf32> to vector<32x256xf32>
    %c0_2 = arith.constant 0 : index
    %c0_3 = arith.constant 0 : index
    %2 = vector.load %arg2[%c0_2, %c0_3] : memref<32x32xf32, #tpu.memory_space<vmem>>, vector<32x32xf32>
    %c0_4 = arith.constant 0 : index
    %c0_5 = arith.constant 0 : index
    %3 = vector.load %arg3[%c0_4, %c0_5] : memref<32x1xf32, #tpu.memory_space<vmem>>, vector<32x1xf32>
    %c0_6 = arith.constant 0 : index
    %c0_7 = arith.constant 0 : index
    %4 = vector.load %arg4[%c0_6, %c0_7] : memref<32x1xf32, #tpu.memory_space<vmem>>, vector<32x1xf32>
    %c0_8 = arith.constant 0 : index
    %c0_9 = arith.constant 0 : index
    %5 = vector.load %arg5[%c0_8, %c0_9] : memref<32x1xf32, #tpu.memory_space<vmem>>, vector<32x1xf32>
    %cst = arith.constant dense<0.000000e+00> : vector<32x256xf32>
    %6 = tpu.matmul %2, %1, %cst {dimension_numbers = #tpu.dot_dimension_numbers<[1], [0], [0], [1], [0, 0, 1, 1], [], []>} : vector<32x32xf32>, vector<32x256xf32>, vector<32x256xf32> -> vector<32x256xf32>
    %7 = vector.broadcast %3 : vector<32x1xf32> to vector<32x256xf32>
    %8 = arith.addf %6, %7 : vector<32x256xf32>
    %9 = vector.broadcast %4 : vector<32x1xf32> to vector<32x256xf32>
    %10 = arith.mulf %8, %9 : vector<32x256xf32>
    %11 = vector.broadcast %5 : vector<32x1xf32> to vector<32x256xf32>
    %12 = arith.addf %10, %11 : vector<32x256xf32>
    %13 = arith.addf %12, %1 : vector<32x256xf32>
    %cst_10 = arith.constant 0.000000e+00 : f32
    %14 = vector.broadcast %cst_10 : f32 to vector<32x256xf32>
    %15 = arith.maximumf %13, %14 : vector<32x256xf32>
    %16 = vector.shape_cast %15 : vector<32x256xf32> to vector<1x32x256xf32>
    %cst_11 = arith.constant dense<0.000000e+00> : vector<1xf32>
    %17 = vector.multi_reduction <add>, %16, %cst_11 [1, 2] : vector<1x32x256xf32> to vector<1xf32>
    %18 = vector.shape_cast %17 : vector<1xf32> to vector<1x1x1xf32>
    %19 = vector.extract %18[0, 0, 0] : f32 from vector<1x1x1xf32>
    %cst_12 = arith.constant 8.192000e+03 : f32
    %20 = arith.divf %19, %cst_12 : f32
    %21 = vector.broadcast %20 : f32 to vector<32x256xf32>
    %22 = arith.subf %15, %21 : vector<32x256xf32>
    %23 = arith.mulf %22, %22 : vector<32x256xf32>
    %24 = vector.shape_cast %23 : vector<32x256xf32> to vector<1x32x256xf32>
    %cst_13 = arith.constant dense<0.000000e+00> : vector<1xf32>
    %25 = vector.multi_reduction <add>, %24, %cst_13 [1, 2] : vector<1x32x256xf32> to vector<1xf32>
    %26 = vector.shape_cast %25 : vector<1xf32> to vector<1x1x1xf32>
    %27 = vector.extract %26[0, 0, 0] : f32 from vector<1x1x1xf32>
    %cst_14 = arith.constant 8.192000e+03 : f32
    %28 = arith.divf %27, %cst_14 : f32
    %cst_15 = arith.constant 9.99999974E-6 : f32
    %29 = arith.addf %28, %cst_15 : f32
    %30 = math.rsqrt %29 : f32
    %31 = vector.broadcast %30 : f32 to vector<32x256xf32>
    %32 = arith.mulf %22, %31 : vector<32x256xf32>
    %c0_16 = arith.constant 0 : index
    %c0_17 = arith.constant 0 : index
    %33 = vector.load %arg6[%c0_16, %c0_17] : memref<32x256xf32, #tpu.memory_space<vmem>>, vector<32x256xf32>
    %34 = arith.mulf %32, %33 : vector<32x256xf32>
    %c0_18 = arith.constant 0 : index
    %c0_19 = arith.constant 0 : index
    %35 = vector.load %arg7[%c0_18, %c0_19] : memref<32x256xf32, #tpu.memory_space<vmem>>, vector<32x256xf32>
    %36 = arith.addf %34, %35 : vector<32x256xf32>
    %c0_20 = arith.constant 0 : index
    %c0_21 = arith.constant 0 : index
    %c0_22 = arith.constant 0 : index
    %37 = vector.load %arg8[%c0_20, %c0_21, %c0_22] : memref<1x32x256xf32, #tpu.memory_space<vmem>>, vector<1x32x256xf32>
    %38 = vector.shape_cast %37 : vector<1x32x256xf32> to vector<32x256xf32>
    %39 = vector.shape_cast %36 : vector<32x256xf32> to vector<1x32x256xf32>
    tpu.vector_store %arg8[%c0_20, %c0_21, %c0_22], %39 {strides = array<i32>} : memref<1x32x256xf32, #tpu.memory_space<vmem>>, vector<1x32x256xf32>,
    return
  }
  func.func @transform_0(%arg0: i32) -> (i32, i32, i32) {
    %c0_i32 = arith.constant 0 : i32
    %c0_i32_0 = arith.constant 0 : i32
    %c0_i32_1 = arith.constant 0 : i32
    return %arg0, %c0_i32, %c0_i32_0 : i32, i32, i32
  }
  func.func @transform_1(%arg0: i32) -> (i32, i32) {
    %c0_i32 = arith.constant 0 : i32
    %c0_i32_0 = arith.constant 0 : i32
    %c0_i32_1 = arith.constant 0 : i32
    return %c0_i32, %c0_i32_0 : i32, i32
  }
  func.func @transform_2(%arg0: i32) -> (i32, i32) {
    %c0_i32 = arith.constant 0 : i32
    %c0_i32_0 = arith.constant 0 : i32
    %c0_i32_1 = arith.constant 0 : i32
    return %c0_i32, %c0_i32_0 : i32, i32
  }
  func.func @transform_3(%arg0: i32) -> (i32, i32) {
    %c0_i32 = arith.constant 0 : i32
    %c0_i32_0 = arith.constant 0 : i32
    %c0_i32_1 = arith.constant 0 : i32
    return %c0_i32, %c0_i32_0 : i32, i32
  }
  func.func @transform_4(%arg0: i32) -> (i32, i32) {
    %c0_i32 = arith.constant 0 : i32
    %c0_i32_0 = arith.constant 0 : i32
    %c0_i32_1 = arith.constant 0 : i32
    return %c0_i32, %c0_i32_0 : i32, i32
  }
  func.func @transform_5(%arg0: i32) -> (i32, i32) {
    %c0_i32 = arith.constant 0 : i32
    %c0_i32_0 = arith.constant 0 : i32
    %c0_i32_1 = arith.constant 0 : i32
    return %c0_i32, %c0_i32_0 : i32, i32
  }
  func.func @transform_6(%arg0: i32) -> (i32, i32) {
    %c0_i32 = arith.constant 0 : i32
    %c0_i32_0 = arith.constant 0 : i32
    %c0_i32_1 = arith.constant 0 : i32
    return %c0_i32, %c0_i32_0 : i32, i32
  }
  func.func @transform_7(%arg0: i32) -> (i32, i32, i32) {
    %c0_i32 = arith.constant 0 : i32
    %c0_i32_0 = arith.constant 0 : i32
    %c0_i32_1 = arith.constant 0 : i32
    return %arg0, %c0_i32, %c0_i32_0 : i32, i32, i32
  }
}

</mosaic_0001>

<bundles_post_ra>
// kernel: my_adapter_dict_forward.3
= control target key start
LH: loop header
LB: loop body
LE: loop exit
PB: predicated region body
PF: predicated region fallthrough
CT: control target
= control target key end

     0   :  { %s759_s24 = smov 0   ;;  %s911_s0 = inlined_call_operand.vmem [shape: f32[2,32,256], index: 0, kind: input, shape index: {}]   ;;  %s912_s1 = inlined_call_operand.vmem [shape: f32[32,32], index: 1, kind: input, shape index: {}]   ;;  %s913_s2 = inlined_call_operand.vmem [shape: f32[32,1], index: 2, kind: input, shape index: {}]   ;;  %s914_s3 = inlined_call_operand.vmem [shape: f32[32,1], index: 3, kind: input, shape index: {}]   ;;  %s915_s4 = inlined_call_operand.vmem [shape: f32[32,1], index: 4, kind: input, shape index: {}]   ;;  %s916_s5 = inlined_call_operand.vmem [shape: f32[32,256], index: 5, kind: input, shape index: {}]   ;;  %s917_s6 = inlined_call_operand.vmem [shape: f32[32,256], index: 6, kind: input, shape index: {}]   ;;  %s918_s7 = inlined_call_operand.vmem [shape: f32[2,32,256], index: 7, kind: output, shape index: {}]  }
   0x1 LB: > { %s660_s25 = sadd.s32 4294967295, %s715_s24   ;;  %p664_p0 = scmp.ge.s32.totalorder %s715_s24, 1  ;;  %s715_s24 = sphi %s759_s24, %s17_s24  }
   0x2   : > { %p237_p1 = scmp.lt.s32.totalorder %s715_s24, 3 }
   0x4   : > { %p238_p2 = pnand %p664_p0, %p237_p1 }
   0x5   : > { %p269_p3 = scmp.lt.s32.totalorder (!%p238_p2), %s660_s25, 1  ;;  %v717_v0 = vmov (!%p238_p2), 0.0   ;;  %v291_v1 = vld [vmem:[%s913_s2] sm:$0xff] (!%p238_p2)  ;;  %v718_v3 = vmov (!%p238_p2), 0   ;;  %v292_v4 = vld [vmem:[%s913_s2 + $0x8] sm:$0xff] (!%p238_p2)  ;;  %v293_v18 = vld [vmem:[%s913_s2 + $0x10] sm:$0xff] (!%p238_p2) }
   0x6   : > { %241 = sbr.rel (%p238_p2) target bundleno = 771 (0x303), region = 48  ;;  %400 = vmatprep.mubr.f32.mxu0 (!%p238_p2), %v717_v0  ;;  %412 = vmatprep.mubr.f32.mxu1 (!%p238_p2), %v717_v0  ;;  %v295_v2 = vld [vmem:[%s914_s3] sm:$0xff] (!%p238_p2)  ;;  %v296_v5 = vld [vmem:[%s914_s3 + $0x8] sm:$0xff] (!%p238_p2)  ;;  %v297_v21 = vld [vmem:[%s914_s3 + $0x10] sm:$0xff] (!%p238_p2)  ;;  %vm323_vm0 = vcmask (!%p238_p2), 261120  }
   0x7   : > { %705 = vset.pattern.permute.xlu0 (!%p238_p2), %v718_v3  ;;  %706 = vset.pattern.permute.xlu1 (!%p238_p2), %v718_v3  ;;  %v299_v17 = vld [vmem:[%s915_s4] sm:$0xff] (!%p238_p2)  ;;  %v300_v20 = vld [vmem:[%s915_s4 + $0x8] sm:$0xff] (!%p238_p2)  ;;  %v289_v23 = vld [vmem:[%s912_s1 + $0x10] sm:$0xff] (!%p238_p2) }
   0x8   : > { %305 = vperm.xlu0 (!%p238_p2), %705, %v291_v1   ;;  %427 = vperm.xlu1 (!%p238_p2), %706, %v295_v2   ;;  %v287_v22 = vld [vmem:[%s912_s1] sm:$0xff] (!%p238_p2)  ;;  %v294_v24 = vld [vmem:[%s913_s2 + $0x18] sm:$0xff] (!%p238_p2)  ;;  %v301_v25 = vld [vmem:[%s915_s4 + $0x10] sm:$0xff] (!%p238_p2) }
   0x9   : > { %v288_v26 = vld [vmem:[%s912_s1 + $0x8] sm:$0xff] (!%p238_p2)  ;;  %v290_v27 = vld [vmem:[%s912_s1 + $0x18] sm:$0xff] (!%p238_p2) }
   0xa   : > { %v298_v28 = vld [vmem:[%s914_s3 + $0x18] sm:$0xff] (!%p238_p2) }
   0xb   : > { %v302_v29 = vld [vmem:[%s915_s4 + $0x18] sm:$0xff] (!%p238_p2) }
   0xc   : > { %310 = vperm.xlu0 (!%p238_p2), %705, %v292_v4   ;;  %432 = vperm.xlu1 (!%p238_p2), %706, %v296_v5  }
   0xd   : > { %s920_s25 = smov (!%p269_p3, %s660_s25), 1 }
   0xe   : > { %s675_s30 = sshll.u32 %s920_s25, 6 }
   0xf   : > { %s273_s14 = scalar_lea.vmem %s911_s0, %s675_s30 }
  0x10   : > { %v787_v6 = vld [vmem:[%s273_s14 + $0x8] sm:$0xff]  ;;  %v789_v7 = vld [vmem:[%s273_s14 + $0x18] sm:$0xff]  ;;  %v791_v8 = vld [vmem:[%s273_s14] sm:$0xff]  ;;  %455 = vperm.xlu0 %705, %v299_v17   ;;  %315 = vperm.xlu1 %706, %v293_v18  }
  0x11   : > { %v677_v9 = vpack.c.bf16 %v789_v7, %v787_v6  ;;  %v795_v10 = vld [vmem:[%s273_s14 + $0x10] sm:$0xff]  ;;  %v797_v11 = vld [vmem:[%s273_s14 + $0x28] sm:$0xff]  ;;  %v799_v12 = vld [vmem:[%s273_s14 + $0x38] sm:$0xff] }
  0x12   : > { %v679_v13 = vpack.c.bf16 %v795_v10, %v791_v8  ;;  %v681_v14 = vpack.c.bf16 %v799_v12, %v797_v11  ;;  %v805_v15 = vld [vmem:[%s273_s14 + $0x20] sm:$0xff]  ;;  %v807_v16 = vld [vmem:[%s273_s14 + $0x30] sm:$0xff] }
  0x13   : > { %678 = vmatprep.subr.bf16.mxu0 %v677_v9  ;;  %685 = vmatprep.subr.bf16.mxu1 %v677_v9  ;;  %v683_v19 = vpack.c.bf16 %v807_v16, %v805_v15 }
  0x14   : > { %680 = vmatpush1.bf16.msra.mxu0 %v679_v13  ;;  %687 = vmatpush1.bf16.msra.mxu1 %v679_v13 }
  0x15   : > { %682 = vmatprep.subr.bf16.mxu0 %v681_v14  ;;  %686 = vmatprep.subr.bf16.mxu1 %v681_v14 }
  0x16   : > { %460 = vperm.xlu0 %705, %v300_v20   ;;  %437 = vperm.xlu1 %706, %v297_v21  }
  0x18   : > { %684 = vmatpush1.bf16.msra.mxu0 %v683_v19  ;;  %688 = vmatpush1.bf16.msra.mxu1 %v683_v19 }
  0x1a   : > { %320 = vperm.xlu0 %705, %v294_v24   ;;  %465 = vperm.xlu1 %706, %v301_v25  }
  0x1b   : > { %669 = vmatmul.mubr.msk.f32.vlgmr.msra.gmra.mrb[0].mxu0 %vm323_vm0, %v287_v22  ;;  %671 = vmatmul.mubr.msk.f32.vlgmr.msra.gmra.mrb[0].mxu1 %vm323_vm0, %v289_v23 }
  0x1c   : > { %406 = vmatprep.mubr.f32.mxu0 %v717_v0  ;;  %418 = vmatprep.mubr.f32.mxu1 %v717_v0 }
  0x1e   : > { %442 = vperm.xlu0 %705, %v298_v28   ;;  %470 = vperm.xlu1 %706, %v302_v29  }
  0x1f   : > { %670 = vmatmul.mubr.msk.f32.gmra.mrb[2].mxu0 %vm323_vm0, %v288_v26  ;;  %672 = vmatmul.mubr.msk.f32.gmra.mrb[2].mxu1 %vm323_vm0, %v290_v27 }
  0x87   : > { %v306_v30 = vpop.permute.xlu0 %305  ;;  %v428_v31 = vpop.permute.xlu1 %427 }
  0x8b   : > { %v311_v32 = vpop.permute.xlu0 %310  ;;  %v433_v33 = vpop.permute.xlu1 %432 }
  0x8f   : > { %v456_v34 = vpop.permute.xlu0 %455  ;;  %v316_v35 = vpop.permute.xlu1 %315 }
  0x95   : > { %v461_v36 = vpop.permute.xlu0 %460  ;;  %v438_v37 = vpop.permute.xlu1 %437 }
  0x99   : > { %v321_v44 = vpop.permute.xlu0 %320  ;;  %v466_v57 = vpop.permute.xlu1 %465 }
  0x9d   : > { %v443_v0 = vpop.permute.xlu0 %442  ;;  %v471_v20 = vpop.permute.xlu1 %470 }
  0xee   : > { %v402_v38 = vpop.f32.mrb[0].mxu0  ;;  %v414_v39 = vpop.f32.mrb[0].mxu1 }
  0xef   : > { %v403_v40 = vadd.f32 %v402_v38, %v306_v30  ;;  %v415_v41 = vadd.f32 %v414_v39, %v316_v35  ;;  %v404_v42 = vpop.f32.mrb[1].mxu0  ;;  %v416_v43 = vpop.f32.mrb[1].mxu1 }
  0xf0   : > { %v405_v45 = vadd.f32 %v404_v42, %v306_v30  ;;  %v417_v47 = vadd.f32 %v416_v43, %v316_v35 }
  0xf1   : > { %v445_v46 = vmul.f32 %v428_v31, %v403_v40  ;;  %v449_v52 = vmul.f32 %v438_v37, %v415_v41 }
  0xf2   : > { %v446_v48 = vmul.f32 %v428_v31, %v405_v45  ;;  %v408_v49 = vpop.f32.mrb[2].mxu0  ;;  %v420_v50 = vpop.f32.mrb[2].mxu1  ;;  %v450_v61 = vmul.f32 %v438_v37, %v417_v47 }
  0xf3   : > { %v473_v51 = vadd.f32 %v456_v34, %v445_v46  ;;  %v409_v53 = vadd.f32 %v408_v49, %v311_v32  ;;  %v421_v54 = vadd.f32 %v420_v50, %v321_v44  ;;  %v410_v55 = vpop.f32.mrb[3].mxu0  ;;  %v422_v56 = vpop.f32.mrb[3].mxu1  ;;  %v477_v4 = vadd.f32 %v466_v57, %v449_v52 }
  0xf4   : > { %v474_v58 = vadd.f32 %v456_v34, %v446_v48  ;;  %v411_v59 = vadd.f32 %v410_v55, %v311_v32  ;;  %v423_v63 = vadd.f32 %v422_v56, %v321_v44  ;;  %v478_v17 = vadd.f32 %v466_v57, %v450_v61 }
  0xf5   : > { %v481_v60 = vadd.f32 %v473_v51, %v791_v8  ;;  %v447_v62 = vmul.f32 %v433_v33, %v409_v53  ;;  %v451_v9 = vmul.f32 %v443_v0, %v421_v54  ;;  %v485_v22 = vadd.f32 %v477_v4, %v805_v15 }
  0xf6   : > { %v482_v1 = vadd.f32 %v474_v58, %v787_v6  ;;  %v448_v2 = vmul.f32 %v433_v33, %v411_v59  ;;  %v452_v19 = vmul.f32 %v443_v0, %v423_v63  ;;  %v486_v25 = vadd.f32 %v478_v17, %v797_v11  ;;  %v565_v17 = vld [vmem:[%s916_s5] sm:$0xff] }
  0xf7   : > { %v489_v3 = vmax.f32 %v481_v60, 0.0  ;;  %v475_v5 = vadd.f32 %v461_v36, %v447_v62  ;;  %v479_v24 = vadd.f32 %v471_v20, %v451_v9  ;;  %v493_v28 = vmax.f32 %v485_v22, 0.0  ;;  %v570_v22 = vld [vmem:[%s916_s5 + $0x28] sm:$0xff] }
  0xf8   : > { %v490_v13 = vmax.f32 %v482_v1, 0.0  ;;  %v476_v14 = vadd.f32 %v461_v36, %v448_v2  ;;  %v480_v27 = vadd.f32 %v471_v20, %v452_v19  ;;  %v494_v31 = vmax.f32 %v486_v25, 0.0  ;;  %v567_v19 = vld [vmem:[%s916_s5 + $0x10] sm:$0xff]  ;;  %v568_v20 = vld [vmem:[%s916_s5 + $0x18] sm:$0xff] }
  0xf9   : > { %v483_v18 = vadd.f32 %v475_v5, %v795_v10  ;;  %v487_v30 = vadd.f32 %v479_v24, %v807_v16 }
  0xfa   : > { %v497_v21 = vadd.f32 %v490_v13, %v489_v3  ;;  %v484_v8 = vadd.f32 %v476_v14, %v789_v7  ;;  %v488_v10 = vadd.f32 %v480_v27, %v799_v12  ;;  %v572_v27 = vld [vmem:[%s916_s5 + $0x38] sm:$0xff] }
  0xfb   : > { %v491_v23 = vmax.f32 %v483_v18, 0.0  ;;  %v495_v33 = vmax.f32 %v487_v30, 0.0  ;;  %v566_v18 = vld [vmem:[%s916_s5 + $0x8] sm:$0xff] }
  0xfc   : > { %v492_v6 = vmax.f32 %v484_v8, 0.0  ;;  %v496_v7 = vmax.f32 %v488_v10, 0.0  ;;  %v569_v8 = vld [vmem:[%s916_s5 + $0x20] sm:$0xff] }
  0xfd   : > { %v498_v26 = vadd.f32 %v497_v21, %v491_v23 }
  0xff   : > { %v499_v29 = vadd.f32 %v498_v26, %v492_v6 }
 0x101   : > { %v500_v32 = vadd.f32 %v499_v29, %v493_v28  ;;  %v582_v29 = vld [vmem:[%s917_s6 + $0x8] sm:$0xff] }
 0x103   : > { %v501_v34 = vadd.f32 %v500_v32, %v494_v31 }
 0x105   : > { %v502_v35 = vadd.f32 %v501_v34, %v495_v33  ;;  %v584_v34 = vld [vmem:[%s917_s6 + $0x18] sm:$0xff] }
 0x107   : > { %v503_v15 = vadd.f32 %v502_v35, %v496_v7 }
 0x109   : > { %504 = vadd.xlane.f32.xlu0 %v503_v15 }
 0x196   : > { %v505_v36 = vpop.xlane.xlu0 %504 }
 0x197   : > { %v506_v37 = vrot.slane %v505_v36, 4 }
 0x199   : > { %v507_v38 = vadd.f32 %v506_v37, %v505_v36 }
 0x19b   : > { %v508_v11 = vrot.slane %v507_v38, 2 }
 0x19d   : > { %v509_v39 = vadd.f32 %v508_v11, %v507_v38  ;;  %v586_v38 = vld [vmem:[%s917_s6 + $0x28] sm:$0xff]  ;;  %v587_v11 = vld [vmem:[%s917_s6 + $0x30] sm:$0xff] }
 0x19f   : > { %v510_v40 = vrot.slane %v509_v39, 1 }
 0x1a1   : > { %v511_v41 = vadd.f32 %v510_v40, %v509_v39  ;;  %v588_v39 = vld [vmem:[%s917_s6 + $0x38] sm:$0xff] }
 0x1a3   : > { %689 = vpush %v511_v41 }
 0x1d4   : > { %s690_s19 = spop %689 }
 0x1d5   : > { %s515_s20 = smul.f32 0.00012207031, %s690_s19  ;;  %s278_s19 = scalar_lea.vmem %s918_s7, %s675_s30 }
 0x1d7   : > { %v516_v16 = vstv %s515_s20 }
 0x1d8   : > { %v517_v42 = vsub.f32 %v489_v3, %v516_v16  ;;  %v518_v12 = vsub.f32 %v490_v13, %v516_v16  ;;  %v519_v43 = vsub.f32 %v491_v23, %v516_v16  ;;  %v520_v44 = vsub.f32 %v492_v6, %v516_v16  ;;  %v571_v23 = vld [vmem:[%s916_s5 + $0x30] sm:$0xff] }
 0x1d9   : > { %v521_v47 = vsub.f32 %v493_v28, %v516_v16  ;;  %v522_v50 = vsub.f32 %v494_v31, %v516_v16  ;;  %v523_v53 = vsub.f32 %v495_v33, %v516_v16  ;;  %v524_v56 = vsub.f32 %v496_v7, %v516_v16  ;;  %v581_v28 = vld [vmem:[%s917_s6] sm:$0xff]  ;;  %v583_v33 = vld [vmem:[%s917_s6 + $0x10] sm:$0xff] }
 0x1da   : > { %v525_v45 = vmul.f32 %v517_v42, %v517_v42  ;;  %v526_v46 = vmul.f32 %v518_v12, %v518_v12  ;;  %v527_v48 = vmul.f32 %v519_v43, %v519_v43  ;;  %v528_v51 = vmul.f32 %v520_v44, %v520_v44  ;;  %v585_v7 = vld [vmem:[%s917_s6 + $0x20] sm:$0xff] }
 0x1db   : > { %v529_v54 = vmul.f32 %v521_v47, %v521_v47  ;;  %v530_v57 = vmul.f32 %v522_v50, %v522_v50  ;;  %v531_v59 = vmul.f32 %v523_v53, %v523_v53  ;;  %v532_v61 = vmul.f32 %v524_v56, %v524_v56 }
 0x1dc   : > { %v533_v49 = vadd.f32 %v526_v46, %v525_v45 }
 0x1de   : > { %v534_v52 = vadd.f32 %v533_v49, %v527_v48 }
 0x1e0   : > { %v535_v55 = vadd.f32 %v534_v52, %v528_v51 }
 0x1e2   : > { %v536_v58 = vadd.f32 %v535_v55, %v529_v54 }
 0x1e4   : > { %v537_v60 = vadd.f32 %v536_v58, %v530_v57 }
 0x1e6   : > { %v538_v62 = vadd.f32 %v537_v60, %v531_v59 }
 0x1e8   : > { %v539_v63 = vadd.f32 %v538_v62, %v532_v61 }
 0x1ea   : > { %540 = vadd.xlane.f32.xlu1 %v539_v63 }
 0x277   : > { %v541_v0 = vpop.xlane.xlu1 %540 }
 0x278   : > { %v542_v1 = vrot.slane %v541_v0, 4 }
 0x27a   : > { %v543_v2 = vadd.f32 %v542_v1, %v541_v0 }
 0x27c   : > { %v544_v3 = vrot.slane %v543_v2, 2 }
 0x27e   : > { %v545_v4 = vadd.f32 %v544_v3, %v543_v2 }
 0x280   : > { %v546_v5 = vrot.slane %v545_v4, 1 }
 0x282   : > { %v547_v9 = vadd.f32 %v546_v5, %v545_v4 }
 0x284   : > { %691 = vpush %v547_v9 }
 0x2b5   : > { %s692_s21 = spop %691 }
 0x2b6   : > { %s551_s22 = smul.f32 0.00012207031, %s692_s21 }
 0x2b8   : > { %s552_s23 = sadd.f32 1e-05, %s551_s22 }
 0x2ba   : > { %v553_v13 = vstv %s552_s23 }
 0x2bb   : > { %707 = vrsqrt.f32 %v553_v13 }
 0x2c5   : > { %v708_v14 = vpop.eup %707 }
 0x2c6   : > { %693 = vpush %v708_v14 }
 0x2f7   : > { %s694_s28 = spop %693 }
 0x2f8   : > { %v556_v21 = vstv %s694_s28 }
 0x2f9   : > { %v557_v24 = vmul.f32 %v556_v21, %v517_v42  ;;  %v558_v6 = vmul.f32 %v556_v21, %v518_v12  ;;  %v559_v25 = vmul.f32 %v556_v21, %v519_v43  ;;  %v560_v26 = vmul.f32 %v556_v21, %v520_v44 }
 0x2fa   : > { %v561_v30 = vmul.f32 %v556_v21, %v521_v47  ;;  %v562_v31 = vmul.f32 %v556_v21, %v522_v50  ;;  %v563_v10 = vmul.f32 %v556_v21, %v523_v53  ;;  %v564_v32 = vmul.f32 %v556_v21, %v524_v56 }
 0x2fb   : > { %v573_v35 = vmul.f32 %v565_v17, %v557_v24  ;;  %v574_v15 = vmul.f32 %v566_v18, %v558_v6  ;;  %v575_v36 = vmul.f32 %v567_v19, %v559_v25  ;;  %v576_v37 = vmul.f32 %v568_v20, %v560_v26 }
 0x2fc   : > { %v577_v40 = vmul.f32 %v569_v8, %v561_v30  ;;  %v578_v41 = vmul.f32 %v570_v22, %v562_v31  ;;  %v579_v16 = vmul.f32 %v571_v23, %v563_v10  ;;  %v580_v42 = vmul.f32 %v572_v27, %v564_v32 }
 0x2fd   : > { %v589_v12 = vadd.f32 %v581_v28, %v573_v35  ;;  %v590_v43 = vadd.f32 %v582_v29, %v574_v15  ;;  %v591_v44 = vadd.f32 %v583_v33, %v575_v36  ;;  %v592_v45 = vadd.f32 %v584_v34, %v576_v37 }
 0x2fe   : > { %v593_v46 = vadd.f32 %v585_v7, %v577_v40  ;;  %v594_v47 = vadd.f32 %v586_v38, %v578_v41  ;;  %v595_v48 = vadd.f32 %v587_v11, %v579_v16  ;;  %v596_v49 = vadd.f32 %v588_v39, %v580_v42 }
 0x2ff   : > { %597 = vst [vmem:[%s278_s19] sm:$0xff] %v589_v12  ;;  %598 = vst [vmem:[%s278_s19 + $0x8] sm:$0xff] %v590_v43 }
 0x300   : > { %599 = vst [vmem:[%s278_s19 + $0x10] sm:$0xff] %v591_v44  ;;  %600 = vst [vmem:[%s278_s19 + $0x18] sm:$0xff] %v592_v45 }
 0x301   : > { %601 = vst [vmem:[%s278_s19 + $0x20] sm:$0xff] %v593_v46  ;;  %602 = vst [vmem:[%s278_s19 + $0x28] sm:$0xff] %v594_v47 }
 0x302   : > { %603 = vst [vmem:[%s278_s19 + $0x30] sm:$0xff] %v595_v48  ;;  %604 = vst [vmem:[%s278_s19 + $0x38] sm:$0xff] %v596_v49 }
 0x303 PF: > { %s17_s24 = sadd.s32 1, %s715_s24  }
 0x304   : > { %p14_p4 = scmp.ge.s32.totalorder %s17_s24, 4  }
 0x306   :  { %16 = sbr.rel (!%p14_p4) target bundleno = 1 (0x1), region = 78 }

// kernel: my_adapter_dict_forward.2
= control target key start
LH: loop header
LB: loop body
LE: loop exit
PB: predicated region body
PF: predicated region fallthrough
CT: control target
= control target key end

     0   :  { %s1364_s15 = smov 0   ;;  %s1366_s16 = smov 0   ;;  %s1606_s0 = inlined_call_operand.vmem [shape: f32[2,32,256], index: 0, kind: input, shape index: {}]   ;;  %s1607_s1 = inlined_call_operand.vmem [shape: f32[32,32], index: 1, kind: input, shape index: {}]   ;;  %s1608_s2 = inlined_call_operand.vmem [shape: f32[32,1], index: 2, kind: input, shape index: {}]   ;;  %s1609_s3 = inlined_call_operand.vmem [shape: f32[2,1,32], index: 3, kind: output, shape index: {0}]   ;;  %s1610_s4 = inlined_call_operand.vmem [shape: f32[2,1,32], index: 4, kind: output, shape index: {1}]  }
   0x1   :  { %s1368_s17 = smov 0  }
   0x2 LB: > { %s27_s18 = sadd.s32 1, %s1330_s16  ;;  %p1261_p0 = scmp.ge.s32.totalorder %s1334_s17, 1  ;;  %s1334_s17 = sphi %s1368_s17, %s15_s17   ;;  %s1330_s16 = sphi %s1366_s16, %s1612_s16   ;;  %s1326_s15 = sphi %s1364_s15, %s1611_s15  }
   0x3   : > { %p29_p1 = scmp.ge.s32.totalorder %s27_s18, 2  ;;  %p184_p2 = scmp.lt.s32.totalorder %s1334_s17, 3 }
   0x5   : > { %s1614_s18 = smov (%p29_p1, %s27_s18), 0  ;;  %p185_p3 = pnand %p1261_p0, %p184_p2 }
   0x6   : > { %p216_p4 = scmp.lt.s32.totalorder (!%p185_p3), %s1326_s15, 1  ;;  %v1336_v0 = vmov (!%p185_p3), 0.0   ;;  %v250_v1 = vld [vmem:[%s1608_s2] sm:$0xff] (!%p185_p3)  ;;  %v252_v2 = vld [vmem:[%s1608_s2 + $0x10] sm:$0xff] (!%p185_p3)  ;;  %v1337_v3 = vmov (!%p185_p3), 0   ;;  %v251_v4 = vld [vmem:[%s1608_s2 + $0x8] sm:$0xff] (!%p185_p3)  ;;  %v393_v58 = vlaneseq (!%p185_p3) }
   0x7   : > { %188 = sbr.rel (%p185_p3) target bundleno = 574 (0x23e), region = 32  ;;  %351 = vmatprep.mubr.f32.mxu0 (!%p185_p3), %v1336_v0  ;;  %363 = vmatprep.mubr.f32.mxu1 (!%p185_p3), %v1336_v0  ;;  %v253_v5 = vld [vmem:[%s1608_s2 + $0x18] sm:$0xff] (!%p185_p3)  ;;  %v238_v18 = vld [vmem:[%s1607_s1] sm:$0xff] (!%p185_p3)  ;;  %vm274_vm0 = vcmask (!%p185_p3), 261120   ;;  %v240_v19 = vld [vmem:[%s1607_s1 + $0x10] sm:$0xff] (!%p185_p3)  ;;  %vm235_vm1 = vcmask (!%p185_p3), 253952  }
   0x8   : > { %1310 = vset.pattern.permute.xlu0 (!%p185_p3), %v1337_v3  ;;  %1311 = vset.pattern.permute.xlu1 (!%p185_p3), %v1337_v3  ;;  %v239_v20 = vld [vmem:[%s1607_s1 + $0x8] sm:$0xff] (!%p185_p3)  ;;  %v241_v21 = vld [vmem:[%s1607_s1 + $0x18] sm:$0xff] (!%p185_p3)  ;;  %v1338_v59 = vmov (!%p185_p3), 1966171168   ;;  %v1417_v61 = vshrl.u32 (!%p185_p3), %v393_v58, 7  ;;  %vm740_vm2 = vcmask (!%p185_p3), 130112  }
   0x9   : > { %256 = vperm.xlu0 (!%p185_p3), %1310, %v250_v1   ;;  %266 = vperm.xlu1 (!%p185_p3), %1311, %v252_v2   ;;  %v526_v60 = vunpack.c.l.s4 (!%p185_p3), %v1338_v59  ;;  %vm747_vm3 = vcmask (!%p185_p3), 195712   ;;  %vm754_vm4 = vcmask (!%p185_p3), 261312  }
   0xa   : > { %v1420_v63 = vsub.s32 (!%p185_p3), 0, %v1417_v61  ;;  %v1423_v1 = vsub.s32 (!%p185_p3), 1, %v1417_v61  ;;  %v1426_v2 = vsub.s32 (!%p185_p3), 2, %v1417_v61  ;;  %v1429_v3 = vsub.s32 (!%p185_p3), 3, %v1417_v61 }
   0xb   : > { %v527_v62 = vunpack.c.0.s8 (!%p185_p3), %v526_v60 }
   0xd   : > { %261 = vperm.xlu0 (!%p185_p3), %1310, %v251_v4   ;;  %271 = vperm.xlu1 (!%p185_p3), %1311, %v253_v5   ;;  %v1432_v4 = vsub.s32 (!%p185_p3), 4, %v1417_v61  ;;  %v1435_v5 = vsub.s32 (!%p185_p3), 5, %v1417_v61 }
   0xe   : > { %s1616_s15 = smov (!%p216_p4, %s1326_s15), 1 }
   0xf   : > { %s1270_s23 = sshll.u32 %s1616_s15, 6  ;;  %s1556_s19 = scalar_lea.vmem %s1609_s3, %s1616_s15 }
  0x10   : > { %s223_s30 = scalar_lea.vmem %s1606_s0, %s1270_s23  ;;  %236 = vst.msk [vmem:[%s1556_s19] sm:$0x1] %vm235_vm1, %v1336_v0  ;;  %s1571_s22 = scalar_lea.vmem %s1610_s4, %s1616_s15 }
  0x11   : > { %v243_v6 = vld [vmem:[%s223_s30 + $0x8] sm:$0xff]  ;;  %v245_v7 = vld [vmem:[%s223_s30 + $0x18] sm:$0xff]  ;;  %v242_v8 = vld [vmem:[%s223_s30] sm:$0xff]  ;;  %237 = vst.msk [vmem:[%s1571_s22] sm:$0x1] %vm235_vm1, %v1336_v0 }
  0x12   : > { %v1271_v9 = vpack.c.bf16 %v245_v7, %v243_v6  ;;  %v244_v10 = vld [vmem:[%s223_s30 + $0x10] sm:$0xff]  ;;  %v247_v11 = vld [vmem:[%s223_s30 + $0x28] sm:$0xff]  ;;  %v249_v12 = vld [vmem:[%s223_s30 + $0x38] sm:$0xff]  ;;  %v1438_v6 = vsub.s32 6, %v1417_v61  ;;  %v1441_v7 = vsub.s32 7, %v1417_v61 }
  0x13   : > { %v1273_v13 = vpack.c.bf16 %v244_v10, %v242_v8  ;;  %v1275_v14 = vpack.c.bf16 %v249_v12, %v247_v11  ;;  %v246_v15 = vld [vmem:[%s223_s30 + $0x20] sm:$0xff]  ;;  %v248_v16 = vld [vmem:[%s223_s30 + $0x30] sm:$0xff]  ;;  %v1444_v10 = vsub.s32 %v527_v62, %v1417_v61 }
  0x14   : > { %1272 = vmatprep.subr.bf16.mxu0 %v1271_v9  ;;  %1279 = vmatprep.subr.bf16.mxu1 %v1271_v9  ;;  %v1277_v17 = vpack.c.bf16 %v248_v16, %v246_v15 }
  0x15   : > { %1274 = vmatpush1.bf16.msra.mxu0 %v1273_v13  ;;  %1281 = vmatpush1.bf16.msra.mxu1 %v1273_v13 }
  0x16   : > { %1276 = vmatprep.subr.bf16.mxu0 %v1275_v14  ;;  %1280 = vmatprep.subr.bf16.mxu1 %v1275_v14 }
  0x19   : > { %1278 = vmatpush1.bf16.msra.mxu0 %v1277_v17  ;;  %1282 = vmatpush1.bf16.msra.mxu1 %v1277_v17 }
  0x1c   : > { %1264 = vmatmul.mubr.msk.f32.vlgmr.msra.gmra.mrb[0].mxu0 %vm274_vm0, %v238_v18  ;;  %1266 = vmatmul.mubr.msk.f32.vlgmr.msra.gmra.mrb[0].mxu1 %vm274_vm0, %v240_v19 }
  0x1d   : > { %357 = vmatprep.mubr.f32.mxu0 %v1336_v0  ;;  %369 = vmatprep.mubr.f32.mxu1 %v1336_v0 }
  0x20   : > { %1265 = vmatmul.mubr.msk.f32.gmra.mrb[2].mxu0 %vm274_vm0, %v239_v20  ;;  %1267 = vmatmul.mubr.msk.f32.gmra.mrb[2].mxu1 %vm274_vm0, %v241_v21 }
  0x88   : > { %v257_v22 = vpop.permute.xlu0 %256  ;;  %v267_v23 = vpop.permute.xlu1 %266 }
  0x8c   : > { %v272_v32 = vpop.permute.xlu1 %271  ;;  %v262_v34 = vpop.permute.xlu0 %261 }
  0xef   : > { %v353_v24 = vpop.f32.mrb[0].mxu0  ;;  %v365_v25 = vpop.f32.mrb[0].mxu1 }
  0xf0   : > { %v354_v26 = vadd.f32 %v353_v24, %v257_v22  ;;  %v366_v27 = vadd.f32 %v365_v25, %v267_v23  ;;  %v355_v28 = vpop.f32.mrb[1].mxu0  ;;  %v367_v29 = vpop.f32.mrb[1].mxu1 }
  0xf1   : > { %v356_v30 = vadd.f32 %v355_v28, %v257_v22  ;;  %v368_v31 = vadd.f32 %v367_v29, %v267_v23 }
  0xf2   : > { %v775_v33 = vmul.f32 %v354_v26, %v354_v26  ;;  %v779_v35 = vmul.f32 %v366_v27, %v366_v27 }
  0xf3   : > { %v776_v36 = vmul.f32 %v356_v30, %v356_v30  ;;  %v780_v37 = vmul.f32 %v368_v31, %v368_v31  ;;  %v359_v38 = vpop.f32.mrb[2].mxu0  ;;  %v371_v39 = vpop.f32.mrb[2].mxu1  ;;  %v383_v40 = vadd.f32 %v368_v31, %v366_v27  ;;  %v377_v41 = vadd.f32 %v356_v30, %v354_v26 }
  0xf4   : > { %v360_v42 = vadd.f32 %v359_v38, %v262_v34  ;;  %v361_v43 = vpop.f32.mrb[3].mxu0  ;;  %v372_v44 = vadd.f32 %v371_v39, %v272_v32  ;;  %v373_v45 = vpop.f32.mrb[3].mxu1 }
  0xf5   : > { %v362_v46 = vadd.f32 %v361_v43, %v262_v34  ;;  %384 = vadd.xlane.f32.xlu1 %v383_v40  ;;  %378 = vadd.xlane.f32.xlu0 %v377_v41  ;;  %v374_v47 = vadd.f32 %v373_v45, %v272_v32  ;;  %v783_v48 = vadd.f32 %v776_v36, %v775_v33 }
  0xf6   : > { %v777_v49 = vmul.f32 %v360_v42, %v360_v42  ;;  %v789_v50 = vadd.f32 %v780_v37, %v779_v35  ;;  %v781_v51 = vmul.f32 %v372_v44, %v372_v44 }
  0xf7   : > { %v778_v52 = vmul.f32 %v362_v46, %v362_v46  ;;  %v782_v53 = vmul.f32 %v374_v47, %v374_v47  ;;  %v380_v54 = vadd.f32 %v362_v46, %v360_v42  ;;  %v386_v55 = vadd.f32 %v374_v47, %v372_v44 }
  0xf9   : > { %381 = vadd.xlane.f32.xlu1 %v380_v54  ;;  %784 = vadd.xlane.f32.xlu0 %v783_v48  ;;  %v786_v56 = vadd.f32 %v778_v52, %v777_v49  ;;  %v792_v57 = vadd.f32 %v782_v53, %v781_v51 }
  0xfd   : > { %387 = vadd.xlane.f32.xlu1 %v386_v55  ;;  %790 = vadd.xlane.f32.xlu0 %v789_v50 }
 0x101   : > { %787 = vadd.xlane.f32.xlu0 %v786_v56 }
 0x105   : > { %793 = vadd.xlane.f32.xlu0 %v792_v57 }
 0x182   : > { %v385_v8 = vpop.xlane.xlu1 %384  ;;  %v379_v9 = vpop.xlane.xlu0 %378 }
 0x183   : > { %v460_v11 = vrot.slane %v385_v8, %v1420_v63  ;;  %v464_v12 = vrot.slane %v385_v8, %v1423_v1  ;;  %v468_v13 = vrot.slane %v385_v8, %v1426_v2  ;;  %v472_v14 = vrot.slane %v385_v8, %v1429_v3 }
 0x184   : > { %v476_v15 = vrot.slane %v385_v8, %v1432_v4  ;;  %v480_v16 = vrot.slane %v385_v8, %v1435_v5  ;;  %v484_v17 = vrot.slane %v385_v8, %v1438_v6  ;;  %v488_v18 = vrot.slane %v385_v8, %v1441_v7 }
 0x185   : > { %v619_v19 = vcombine.low %v460_v11, %v464_v12  ;;  %v620_v20 = vcombine.low %v468_v13, %v472_v14  ;;  %v396_v21 = vrot.slane %v379_v9, %v1420_v63  ;;  %v400_v22 = vrot.slane %v379_v9, %v1423_v1 }
 0x186   : > { %v621_v23 = vcombine.low %v476_v15, %v480_v16  ;;  %v622_v24 = vcombine.low %v484_v17, %v488_v18  ;;  %v404_v25 = vrot.slane %v379_v9, %v1426_v2  ;;  %v408_v26 = vrot.slane %v379_v9, %v1429_v3  ;;  %v382_v27 = vpop.xlane.xlu1 %381  ;;  %v785_v48 = vpop.xlane.xlu0 %784 }
 0x187   : > { %v629_v28 = vrot.slane %v619_v19, %v1444_v10  ;;  %v636_v29 = vrot.slane %v620_v20, %v1444_v10  ;;  %v412_v30 = vrot.slane %v379_v9, %v1432_v4  ;;  %v416_v31 = vrot.slane %v379_v9, %v1435_v5 }
 0x188   : > { %v643_v32 = vrot.slane %v621_v23, %v1444_v10  ;;  %v650_v33 = vrot.slane %v622_v24, %v1444_v10  ;;  %v420_v34 = vrot.slane %v379_v9, %v1438_v6  ;;  %v424_v35 = vrot.slane %v379_v9, %v1441_v7 }
 0x189   : > { %v651_v36 = vcombine.low %v629_v28, %v636_v29  ;;  %v521_v37 = vcombine.low %v396_v21, %v400_v22  ;;  %v522_v38 = vcombine.low %v404_v25, %v408_v26  ;;  %v523_v39 = vcombine.low %v412_v30, %v416_v31 }
 0x18a   : > { %v652_v40 = vcombine.low %v643_v32, %v650_v33  ;;  %v524_v41 = vcombine.low %v420_v34, %v424_v35  ;;  %v428_v42 = vrot.slane %v382_v27, %v1420_v63  ;;  %v432_v43 = vrot.slane %v382_v27, %v1423_v1  ;;  %v388_v17 = vpop.xlane.xlu1 %387  ;;  %v791_v34 = vpop.xlane.xlu0 %790 }
 0x18b   : > { %v659_v44 = vrot.slane %v651_v36, %v1444_v10  ;;  %v531_v45 = vrot.slane %v521_v37, %v1444_v10  ;;  %v538_v46 = vrot.slane %v522_v38, %v1444_v10  ;;  %v545_v47 = vrot.slane %v523_v39, %v1444_v10 }
 0x18c   : > { %v666_v49 = vrot.slane %v652_v40, %v1444_v10  ;;  %v552_v50 = vrot.slane %v524_v41, %v1444_v10  ;;  %v436_v51 = vrot.slane %v382_v27, %v1426_v2  ;;  %v440_v52 = vrot.slane %v382_v27, %v1429_v3 }
 0x18d   : > { %v553_v53 = vcombine.low %v531_v45, %v538_v46  ;;  %v444_v54 = vrot.slane %v382_v27, %v1432_v4  ;;  %v448_v55 = vrot.slane %v382_v27, %v1435_v5  ;;  %v452_v56 = vrot.slane %v382_v27, %v1438_v6 }
 0x18e   : > { %v667_v57 = vcombine.low %v659_v44, %v666_v49  ;;  %v554_v59 = vcombine.low %v545_v47, %v552_v50  ;;  %v456_v60 = vrot.slane %v382_v27, %v1441_v7  ;;  %v570_v62 = vcombine.low %v428_v42, %v432_v43 }
 0x18f   : > { %v561_v8 = vrot.slane %v553_v53, %v1444_v10  ;;  %v571_v9 = vcombine.low %v436_v51, %v440_v52  ;;  %v572_v11 = vcombine.low %v444_v54, %v448_v55  ;;  %v802_v12 = vrot.slane %v785_v48, %v1420_v63 }
 0x190   : > { %724 = vperm.xlu0 %1310, %v667_v57   ;;  %v568_v13 = vrot.slane %v554_v59, %v1444_v10  ;;  %v573_v14 = vcombine.low %v452_v56, %v456_v60  ;;  %v580_v15 = vrot.slane %v570_v62, %v1444_v10  ;;  %v806_v16 = vrot.slane %v785_v48, %v1423_v1  ;;  %v788_v60 = vpop.xlane.xlu0 %787 }
 0x191   : > { %v587_v18 = vrot.slane %v571_v9, %v1444_v10  ;;  %v594_v19 = vrot.slane %v572_v11, %v1444_v10  ;;  %v810_v20 = vrot.slane %v785_v48, %v1426_v2  ;;  %v814_v21 = vrot.slane %v785_v48, %v1429_v3 }
 0x192   : > { %v569_v22 = vcombine.low %v561_v8, %v568_v13  ;;  %v601_v23 = vrot.slane %v573_v14, %v1444_v10  ;;  %v818_v24 = vrot.slane %v785_v48, %v1432_v4  ;;  %v822_v25 = vrot.slane %v785_v48, %v1435_v5 }
 0x193   : > { %v602_v26 = vcombine.low %v580_v15, %v587_v18  ;;  %v826_v27 = vrot.slane %v785_v48, %v1438_v6  ;;  %v830_v28 = vrot.slane %v785_v48, %v1441_v7  ;;  %v927_v29 = vcombine.low %v802_v12, %v806_v16 }
 0x194   : > { %718 = vperm.xlu1 %1311, %v569_v22   ;;  %v603_v30 = vcombine.low %v594_v19, %v601_v23  ;;  %v928_v31 = vcombine.low %v810_v20, %v814_v21  ;;  %v929_v32 = vcombine.low %v818_v24, %v822_v25  ;;  %v492_v33 = vrot.slane %v388_v17, %v1420_v63 }
 0x195   : > { %v610_v35 = vrot.slane %v602_v26, %v1444_v10  ;;  %v930_v36 = vcombine.low %v826_v27, %v830_v28  ;;  %v937_v37 = vrot.slane %v927_v29, %v1444_v10  ;;  %v496_v38 = vrot.slane %v388_v17, %v1423_v1 }
 0x196   : > { %v617_v39 = vrot.slane %v603_v30, %v1444_v10  ;;  %v944_v40 = vrot.slane %v928_v31, %v1444_v10  ;;  %v951_v41 = vrot.slane %v929_v32, %v1444_v10  ;;  %v500_v42 = vrot.slane %v388_v17, %v1426_v2  ;;  %v794_v32 = vpop.xlane.xlu0 %793 }
 0x197   : > { %v958_v43 = vrot.slane %v930_v36, %v1444_v10  ;;  %v504_v44 = vrot.slane %v388_v17, %v1429_v3  ;;  %v508_v45 = vrot.slane %v388_v17, %v1432_v4  ;;  %v512_v46 = vrot.slane %v388_v17, %v1435_v5 }
 0x198   : > { %v618_v47 = vcombine.low %v610_v35, %v617_v39  ;;  %v959_v48 = vcombine.low %v937_v37, %v944_v40  ;;  %v516_v49 = vrot.slane %v388_v17, %v1438_v6  ;;  %v520_v50 = vrot.slane %v388_v17, %v1441_v7 }
 0x199   : > { %v960_v51 = vcombine.low %v951_v41, %v958_v43  ;;  %v668_v52 = vcombine.low %v492_v33, %v496_v38  ;;  %v669_v53 = vcombine.low %v500_v42, %v504_v44  ;;  %v670_v54 = vcombine.low %v508_v45, %v512_v46 }
 0x19a   : > { %721 = vperm.xlu0 %1310, %v618_v47   ;;  %v967_v55 = vrot.slane %v959_v48, %v1444_v10  ;;  %v671_v56 = vcombine.low %v516_v49, %v520_v50  ;;  %v866_v57 = vrot.slane %v791_v34, %v1420_v63  ;;  %v870_v59 = vrot.slane %v791_v34, %v1423_v1 }
 0x19b   : > { %v974_v62 = vrot.slane %v960_v51, %v1444_v10  ;;  %v678_v8 = vrot.slane %v668_v52, %v1444_v10  ;;  %v685_v9 = vrot.slane %v669_v53, %v1444_v10  ;;  %v692_v11 = vrot.slane %v670_v54, %v1444_v10 }
 0x19c   : > { %v699_v12 = vrot.slane %v671_v56, %v1444_v10  ;;  %v874_v13 = vrot.slane %v791_v34, %v1426_v2  ;;  %v878_v14 = vrot.slane %v791_v34, %v1429_v3  ;;  %v882_v15 = vrot.slane %v791_v34, %v1432_v4 }
 0x19d   : > { %v975_v16 = vcombine.low %v967_v55, %v974_v62  ;;  %v700_v17 = vcombine.low %v678_v8, %v685_v9  ;;  %v886_v18 = vrot.slane %v791_v34, %v1435_v5  ;;  %v890_v19 = vrot.slane %v791_v34, %v1438_v6 }
 0x19e   : > { %v701_v20 = vcombine.low %v692_v11, %v699_v12  ;;  %v894_v21 = vrot.slane %v791_v34, %v1441_v7  ;;  %v1025_v22 = vcombine.low %v866_v57, %v870_v59  ;;  %v1026_v23 = vcombine.low %v874_v13, %v878_v14 }
 0x19f   : > { %1124 = vperm.xlu1 %1311, %v975_v16   ;;  %v708_v24 = vrot.slane %v700_v17, %v1444_v10  ;;  %v1027_v25 = vcombine.low %v882_v15, %v886_v18  ;;  %v834_v26 = vrot.slane %v788_v60, %v1420_v63  ;;  %v838_v27 = vrot.slane %v788_v60, %v1423_v1 }
 0x1a0   : > { %v715_v28 = vrot.slane %v701_v20, %v1444_v10  ;;  %v1028_v29 = vcombine.low %v890_v19, %v894_v21  ;;  %v1035_v30 = vrot.slane %v1025_v22, %v1444_v10  ;;  %v1042_v31 = vrot.slane %v1026_v23, %v1444_v10 }
 0x1a1   : > { %v1049_v33 = vrot.slane %v1027_v25, %v1444_v10  ;;  %v842_v34 = vrot.slane %v788_v60, %v1426_v2  ;;  %v846_v35 = vrot.slane %v788_v60, %v1429_v3  ;;  %v850_v36 = vrot.slane %v788_v60, %v1432_v4 }
 0x1a2   : > { %v716_v37 = vcombine.low %v708_v24, %v715_v28  ;;  %v1056_v38 = vrot.slane %v1028_v29, %v1444_v10  ;;  %v1057_v39 = vcombine.low %v1035_v30, %v1042_v31  ;;  %v854_v40 = vrot.slane %v788_v60, %v1435_v5 }
 0x1a3   : > { %v858_v41 = vrot.slane %v788_v60, %v1438_v6  ;;  %v862_v42 = vrot.slane %v788_v60, %v1441_v7  ;;  %v976_v43 = vcombine.low %v834_v26, %v838_v27  ;;  %v977_v44 = vcombine.low %v842_v34, %v846_v35 }
 0x1a4   : > { %727 = vperm.xlu0 %1310, %v716_v37   ;;  %v1058_v45 = vcombine.low %v1049_v33, %v1056_v38  ;;  %v1065_v46 = vrot.slane %v1057_v39, %v1444_v10  ;;  %v978_v47 = vcombine.low %v850_v36, %v854_v40  ;;  %v898_v48 = vrot.slane %v794_v32, %v1420_v63  ;;  %v376_v40 = vld [vmem:[%s1556_s19] sm:$0x1] }
 0x1a5   : > { %v979_v49 = vcombine.low %v858_v41, %v862_v42  ;;  %v986_v50 = vrot.slane %v976_v43, %v1444_v10  ;;  %v993_v51 = vrot.slane %v977_v44, %v1444_v10  ;;  %v902_v52 = vrot.slane %v794_v32, %v1423_v1 }
 0x1a6   : > { %v1072_v53 = vrot.slane %v1058_v45, %v1444_v10  ;;  %v1000_v54 = vrot.slane %v978_v47, %v1444_v10  ;;  %v906_v55 = vrot.slane %v794_v32, %v1426_v2  ;;  %v910_v56 = vrot.slane %v794_v32, %v1429_v3 }
 0x1a7   : > { %v1007_v57 = vrot.slane %v979_v49, %v1444_v10  ;;  %v1008_v59 = vcombine.low %v986_v50, %v993_v51  ;;  %v914_v63 = vrot.slane %v794_v32, %v1432_v4  ;;  %v918_v60 = vrot.slane %v794_v32, %v1435_v5 }
 0x1a8   : > { %v1073_v62 = vcombine.low %v1065_v46, %v1072_v53  ;;  %v922_v8 = vrot.slane %v794_v32, %v1438_v6  ;;  %v926_v1 = vrot.slane %v794_v32, %v1441_v7  ;;  %v1074_v9 = vcombine.low %v898_v48, %v902_v52  ;;  %v774_v53 = vld [vmem:[%s1571_s22] sm:$0x1] }
 0x1a9   : > { %v1009_v11 = vcombine.low %v1000_v54, %v1007_v57  ;;  %v1016_v12 = vrot.slane %v1008_v59, %v1444_v10  ;;  %v1075_v2 = vcombine.low %v906_v55, %v910_v56  ;;  %v1076_v13 = vcombine.low %v914_v63, %v918_v60 }
 0x1aa   : > { %1130 = vperm.xlu1 %1311, %v1073_v62   ;;  %v1077_v3 = vcombine.low %v922_v8, %v926_v1  ;;  %v1084_v14 = vrot.slane %v1074_v9, %v1444_v10  ;;  %v730_v21 = vand.u32 127, %v393_v58 }
 0x1ab   : > { %v1023_v4 = vrot.slane %v1009_v11, %v1444_v10  ;;  %v1091_v5 = vrot.slane %v1075_v2, %v1444_v10  ;;  %v1098_v6 = vrot.slane %v1076_v13, %v1444_v10 }
 0x1ac   : > { %v1105_v7 = vrot.slane %v1077_v3, %v1444_v10  ;;  %v735_v23 = vadd.s32 4294967288, %v730_v21  ;;  %v742_v25 = vadd.s32 4294967280, %v730_v21  ;;  %v733_v27 = vsub.s32 %v730_v21, %v1417_v61 }
 0x1ad   : > { %v1024_v15 = vcombine.low %v1016_v12, %v1023_v4  ;;  %v1106_v16 = vcombine.low %v1084_v14, %v1091_v5  ;;  %v749_v28 = vadd.s32 4294967272, %v730_v21 }
 0x1ae   : > { %v1107_v17 = vcombine.low %v1098_v6, %v1105_v7  ;;  %v738_v24 = vsub.s32 %v735_v23, %v1417_v61  ;;  %v745_v31 = vsub.s32 %v742_v25, %v1417_v61 }
 0x1af   : > { %1127 = vperm.xlu1 %1311, %v1024_v15   ;;  %v1114_v18 = vrot.slane %v1106_v16, %v1444_v10  ;;  %v752_v0 = vsub.s32 %v749_v28, %v1417_v61 }
 0x1b0   : > { %v1121_v19 = vrot.slane %v1107_v17, %v1444_v10 }
 0x1b2   : > { %v1122_v20 = vcombine.low %v1114_v18, %v1121_v19 }
 0x1b4   : > { %1133 = vperm.xlu1 %1311, %v1122_v20  }
 0x20f   : > { %v725_v22 = vpop.permute.xlu0 %724 }
 0x210   : > { %v746_v33 = vrot.slane %v725_v22, %v745_v31 }
 0x213   : > { %v719_v29 = vpop.permute.xlu1 %718 }
 0x214   : > { %v734_v32 = vrot.slane %v719_v29, %v733_v27 }
 0x219   : > { %v722_v26 = vpop.permute.xlu0 %721 }
 0x21a   : > { %v739_v30 = vrot.slane %v722_v26, %v738_v24 }
 0x21c   : > { %v741_v58 = vsel %vm740_vm2, %v739_v30, %v734_v32 }
 0x21d   : > { %v748_v37 = vsel %vm747_vm3, %v746_v33, %v741_v58 }
 0x21e   : > { %v1125_v34 = vpop.permute.xlu1 %1124 }
 0x21f   : > { %v1138_v45 = vrot.slane %v1125_v34, %v733_v27 }
 0x223   : > { %v728_v35 = vpop.permute.xlu0 %727 }
 0x224   : > { %v753_v36 = vrot.slane %v728_v35, %v752_v0 }
 0x226   : > { %v755_v38 = vsel %vm754_vm4, %v753_v36, %v748_v37 }
 0x227   : > { %v762_v39 = vrot.slane %v755_v38, %v1444_v10 }
 0x229   : > { %v1131_v41 = vpop.permute.xlu1 %1130  ;;  %v769_v42 = vrot.slane %v762_v39, %v1444_v10 }
 0x22a   : > { %v1147_v47 = vrot.slane %v1131_v41, %v745_v31 }
 0x22b   : > { %v771_v61 = vadd.f32 %v769_v42, %v376_v40 }
 0x22d   : > { %773 = vst.msk [vmem:[%s1556_s19] sm:$0x1] %vm235_vm1, %v771_v61 }
 0x22e   : > { %v1128_v43 = vpop.permute.xlu1 %1127 }
 0x22f   : > { %v1142_v44 = vrot.slane %v1128_v43, %v738_v24 }
 0x231   : > { %v1143_v46 = vsel %vm740_vm2, %v1142_v44, %v1138_v45 }
 0x232   : > { %v1148_v50 = vsel %vm747_vm3, %v1147_v47, %v1143_v46 }
 0x233   : > { %v1134_v48 = vpop.permute.xlu1 %1133 }
 0x234   : > { %v1152_v49 = vrot.slane %v1134_v48, %v752_v0 }
 0x236   : > { %v1153_v51 = vsel %vm754_vm4, %v1152_v49, %v1148_v50 }
 0x237   : > { %v1160_v52 = vrot.slane %v1153_v51, %v1444_v10 }
 0x239   : > { %v1167_v54 = vrot.slane %v1160_v52, %v1444_v10 }
 0x23b   : > { %v1169_v55 = vadd.f32 %v1167_v54, %v774_v53 }
 0x23d   : > { %1170 = vst.msk [vmem:[%s1571_s22] sm:$0x1] %vm235_vm1, %v1169_v55 }
 0x23e PF: > { %s15_s17 = sadd.s32 1, %s1334_s17   ;;  %s1611_s15 = smov %s1330_s16 }
 0x23f   : > { %p12_p5 = scmp.ge.s32.totalorder %s15_s17, 4   ;;  %s1612_s16 = smov %s1614_s18 }
 0x241   :  { %14 = sbr.rel (!%p12_p5) target bundleno = 2 (0x2), region = 78 }

</bundles_post_ra>
